<compile_context>
chip_gen: v5e
topology: v5e:2x2
jax: 0.10.0
libtpu: 0.0.40
codegen_flags: <defaults>
</compile_context>

<pallas_src>
import functools

import jax
import jax.numpy as jnp
from jax.experimental import pallas as pl
from jax.experimental.pallas import tpu as pltpu


def _seghead_kernel(w_ref, b_ref, x_ref, o_ref, *, c_in, c_out):
    # w_ref: SMEM (c_out * c_in,) f32 -- conv weight, row-major over (out, in)
    # b_ref: SMEM (c_out,)        f32 -- conv bias
    # x_ref: VMEM (c_in,  TILE_S)     -- channels on sublanes, voxels on lanes
    # o_ref: VMEM (c_out, TILE_S)     -- softmax(conv1x1(x)) for this tile
    x = x_ref[...].astype(jnp.float32)

    # Pointwise conv as unrolled VPU broadcast-FMAs (MXU would be <0.1% utilized
    # at K=4, N=3, and this kernel is HBM-bandwidth-bound anyway).
    logits = []
    for o in range(c_out):
        acc = x[0:1, :] * w_ref[o * c_in + 0]
        for c in range(1, c_in):
            acc = acc + x[c:c + 1, :] * w_ref[o * c_in + c]
        logits.append(acc + b_ref[o])

    # Numerically-stable softmax across the c_out rows (sublane axis).
    m = logits[0]
    for o in range(1, c_out):
        m = jnp.maximum(m, logits[o])
    exps = [jnp.exp(l - m) for l in logits]
    denom = exps[0]
    for o in range(1, c_out):
        denom = denom + exps[o]
    inv = pl.reciprocal(denom, approx=True)  # EUP slot -> essentially free

    for o in range(c_out):
        o_ref[o:o + 1, :] = (exps[o] * inv).astype(o_ref.dtype)


@functools.partial(jax.jit, static_argnames=("tile_s",))
def seghead_block(x_in, weight, bias, *, tile_s=2048):
    """Pallas implementation of SegHead_block.forward.

    x_in:   (N, C_in, D, H, W) float32
    weight: (C_out, C_in)      (Conv3d kernel_size=1 weight squeezed)
    bias:   (C_out,)
    returns (N, C_out, D, H, W) float32
    """
    N, C_in, D, H, W = x_in.shape
    C_out = weight.shape[0]
    S = D * H * W

    # Free, contiguous reshapes -- native NCDHW channel order is preserved.
    x3 = x_in.reshape(N, C_in, S)
    w_flat = weight.reshape(C_out * C_in).astype(jnp.float32)
    b_flat = bias.reshape(C_out).astype(jnp.float32)

    # Lane-dense spatial tile: a multiple of 128, or the full spatial extent.
    ts = min(tile_s, S)
    if ts < S:
        ts = max(128, (ts // 128) * 128)
    grid = (N, pl.cdiv(S, ts))

    kernel = functools.partial(_seghead_kernel, c_in=C_in, c_out=C_out)

    out3 = pl.pallas_call(
        kernel,
        out_shape=jax.ShapeDtypeStruct((N, C_out, S), x_in.dtype),
        grid_spec=pltpu.PrefetchScalarGridSpec(
            num_scalar_prefetch=2,  # weight + bias live in SMEM for the whole grid
            grid=grid,
            in_specs=[
                pl.BlockSpec((None, C_in, ts), lambda n, s, w, b: (n, 0, s)),
            ],
            out_specs=pl.BlockSpec((None, C_out, ts), lambda n, s, w, b: (n, 0, s)),
        ),
        compiler_params=pltpu.CompilerParams(
            dimension_semantics=("parallel", "parallel"),
        ),
        cost_estimate=pl.CostEstimate(
            flops=int(N * S * (2 * C_in * C_out + 4 * C_out)),
            transcendentals=int(N * S * (C_out + 1)),
            bytes_accessed=int(N * S * (C_in + C_out) * 4),
        ),
    )(w_flat, b_flat, x3)

    return out3.reshape(N, C_out, D, H, W)


def _reference(x_in, weight, bias):
    # Pure-JAX reference: pointwise conv + softmax over the channel dim.
    y = jnp.einsum("ncdhw,oc->nodhw", x_in, weight) + bias[None, :, None, None, None]
    return jax.nn.softmax(y, axis=1)


if __name__ == "__main__":
    key = jax.random.PRNGKey(0)
    k_x, k_w, k_b = jax.random.split(key, 3)

    # Small shapes consistent with the module: N=2, C_in=4, C_out=3, D=H=W=8.
    N, C_in, C_out, D, H, W = 2, 4, 3, 8, 8, 8

    x_in = jax.random.normal(k_x, (N, C_in, D, H, W), dtype=jnp.float32)

    # Deterministic parameter init (Conv3d kernel_size=1 => weight (C_out, C_in, 1, 1, 1)).
    fan_in = C_in  # * 1 * 1 * 1
    bound = 1.0 / (fan_in ** 0.5)
    weight = jax.random.uniform(
        k_w, (C_out, C_in), minval=-bound, maxval=bound, dtype=jnp.float32
    )
    bias = jax.random.uniform(
        k_b, (C_out,), minval=-bound, maxval=bound, dtype=jnp.float32
    )

    out = seghead_block(x_in, weight, bias)
    out = jax.block_until_ready(out)

    ref = _reference(x_in, weight, bias)
    assert out.shape == (N, C_out, D, H, W)
    # Tolerance accounts for the approximate EUP reciprocal in the softmax
    # denominator; a wrong conv/softmax would be off by orders of magnitude more.
    assert jnp.allclose(out, ref, atol=5e-3, rtol=5e-3), "mismatch vs reference"

    print("KERNEL_OK")
</pallas_src>

<mosaic_0001>
module attributes {stable_mosaic.version = 11 : i64} {
  func.func @_seghead_kernel(%arg0: i32, %arg1: i32, %arg2: memref<12xf32, #tpu.memory_space<smem>>, %arg3: memref<3xf32, #tpu.memory_space<smem>>, %arg4: memref<1x4x512xf32, #tpu.memory_space<vmem>>, %arg5: memref<1x3x512xf32, #tpu.memory_space<vmem>>) attributes {dimension_semantics = [#tpu.dimension_semantics<parallel>, #tpu.dimension_semantics<parallel>], iteration_bounds = array<i64: 2, 1>, scalar_prefetch = 2 : i64, scratch_operands = 0 : i64, tpu.core_type = #tpu.core_type<tc>, window_params = [{transform_indices = @transform_0, window_bounds = array<i64: 1, 4, 512>}, {transform_indices = @transform_1, window_bounds = array<i64: 1, 3, 512>}]} {
    %c0 = arith.constant 0 : index
    %c0_0 = arith.constant 0 : index
    %c0_1 = arith.constant 0 : index
    %0 = vector.load %arg4[%c0, %c0_0, %c0_1] : memref<1x4x512xf32, #tpu.memory_space<vmem>>, vector<1x4x512xf32>
    %1 = vector.shape_cast %0 : vector<1x4x512xf32> to vector<4x512xf32>
    %2 = vector.extract_strided_slice %1 {offsets = [0, 0], sizes = [1, 512], strides = [1, 1]} : vector<4x512xf32> to vector<1x512xf32>
    %c0_2 = arith.constant 0 : index
    %3 = memref.load %arg2[%c0_2] : memref<12xf32, #tpu.memory_space<smem>>
    %4 = vector.broadcast %3 : f32 to vector<1x512xf32>
    %5 = arith.mulf %2, %4 : vector<1x512xf32>
    %6 = vector.extract_strided_slice %1 {offsets = [1, 0], sizes = [1, 512], strides = [1, 1]} : vector<4x512xf32> to vector<1x512xf32>
    %c1 = arith.constant 1 : index
    %7 = memref.load %arg2[%c1] : memref<12xf32, #tpu.memory_space<smem>>
    %8 = vector.broadcast %7 : f32 to vector<1x512xf32>
    %9 = arith.mulf %6, %8 : vector<1x512xf32>
    %10 = arith.addf %5, %9 : vector<1x512xf32>
    %11 = vector.extract_strided_slice %1 {offsets = [2, 0], sizes = [1, 512], strides = [1, 1]} : vector<4x512xf32> to vector<1x512xf32>
    %c2 = arith.constant 2 : index
    %12 = memref.load %arg2[%c2] : memref<12xf32, #tpu.memory_space<smem>>
    %13 = vector.broadcast %12 : f32 to vector<1x512xf32>
    %14 = arith.mulf %11, %13 : vector<1x512xf32>
    %15 = arith.addf %10, %14 : vector<1x512xf32>
    %16 = vector.extract_strided_slice %1 {offsets = [3, 0], sizes = [1, 512], strides = [1, 1]} : vector<4x512xf32> to vector<1x512xf32>
    %c3 = arith.constant 3 : index
    %17 = memref.load %arg2[%c3] : memref<12xf32, #tpu.memory_space<smem>>
    %18 = vector.broadcast %17 : f32 to vector<1x512xf32>
    %19 = arith.mulf %16, %18 : vector<1x512xf32>
    %20 = arith.addf %15, %19 : vector<1x512xf32>
    %c0_3 = arith.constant 0 : index
    %21 = memref.load %arg3[%c0_3] : memref<3xf32, #tpu.memory_space<smem>>
    %22 = vector.broadcast %21 : f32 to vector<1x512xf32>
    %23 = arith.addf %20, %22 : vector<1x512xf32>
    %24 = vector.extract_strided_slice %1 {offsets = [0, 0], sizes = [1, 512], strides = [1, 1]} : vector<4x512xf32> to vector<1x512xf32>
    %c4 = arith.constant 4 : index
    %25 = memref.load %arg2[%c4] : memref<12xf32, #tpu.memory_space<smem>>
    %26 = vector.broadcast %25 : f32 to vector<1x512xf32>
    %27 = arith.mulf %24, %26 : vector<1x512xf32>
    %28 = vector.extract_strided_slice %1 {offsets = [1, 0], sizes = [1, 512], strides = [1, 1]} : vector<4x512xf32> to vector<1x512xf32>
    %c5 = arith.constant 5 : index
    %29 = memref.load %arg2[%c5] : memref<12xf32, #tpu.memory_space<smem>>
    %30 = vector.broadcast %29 : f32 to vector<1x512xf32>
    %31 = arith.mulf %28, %30 : vector<1x512xf32>
    %32 = arith.addf %27, %31 : vector<1x512xf32>
    %33 = vector.extract_strided_slice %1 {offsets = [2, 0], sizes = [1, 512], strides = [1, 1]} : vector<4x512xf32> to vector<1x512xf32>
    %c6 = arith.constant 6 : index
    %34 = memref.load %arg2[%c6] : memref<12xf32, #tpu.memory_space<smem>>
    %35 = vector.broadcast %34 : f32 to vector<1x512xf32>
    %36 = arith.mulf %33, %35 : vector<1x512xf32>
    %37 = arith.addf %32, %36 : vector<1x512xf32>
    %38 = vector.extract_strided_slice %1 {offsets = [3, 0], sizes = [1, 512], strides = [1, 1]} : vector<4x512xf32> to vector<1x512xf32>
    %c7 = arith.constant 7 : index
    %39 = memref.load %arg2[%c7] : memref<12xf32, #tpu.memory_space<smem>>
    %40 = vector.broadcast %39 : f32 to vector<1x512xf32>
    %41 = arith.mulf %38, %40 : vector<1x512xf32>
    %42 = arith.addf %37, %41 : vector<1x512xf32>
    %c1_4 = arith.constant 1 : index
    %43 = memref.load %arg3[%c1_4] : memref<3xf32, #tpu.memory_space<smem>>
    %44 = vector.broadcast %43 : f32 to vector<1x512xf32>
    %45 = arith.addf %42, %44 : vector<1x512xf32>
    %46 = vector.extract_strided_slice %1 {offsets = [0, 0], sizes = [1, 512], strides = [1, 1]} : vector<4x512xf32> to vector<1x512xf32>
    %c8 = arith.constant 8 : index
    %47 = memref.load %arg2[%c8] : memref<12xf32, #tpu.memory_space<smem>>
    %48 = vector.broadcast %47 : f32 to vector<1x512xf32>
    %49 = arith.mulf %46, %48 : vector<1x512xf32>
    %50 = vector.extract_strided_slice %1 {offsets = [1, 0], sizes = [1, 512], strides = [1, 1]} : vector<4x512xf32> to vector<1x512xf32>
    %c9 = arith.constant 9 : index
    %51 = memref.load %arg2[%c9] : memref<12xf32, #tpu.memory_space<smem>>
    %52 = vector.broadcast %51 : f32 to vector<1x512xf32>
    %53 = arith.mulf %50, %52 : vector<1x512xf32>
    %54 = arith.addf %49, %53 : vector<1x512xf32>
    %55 = vector.extract_strided_slice %1 {offsets = [2, 0], sizes = [1, 512], strides = [1, 1]} : vector<4x512xf32> to vector<1x512xf32>
    %c10 = arith.constant 10 : index
    %56 = memref.load %arg2[%c10] : memref<12xf32, #tpu.memory_space<smem>>
    %57 = vector.broadcast %56 : f32 to vector<1x512xf32>
    %58 = arith.mulf %55, %57 : vector<1x512xf32>
    %59 = arith.addf %54, %58 : vector<1x512xf32>
    %60 = vector.extract_strided_slice %1 {offsets = [3, 0], sizes = [1, 512], strides = [1, 1]} : vector<4x512xf32> to vector<1x512xf32>
    %c11 = arith.constant 11 : index
    %61 = memref.load %arg2[%c11] : memref<12xf32, #tpu.memory_space<smem>>
    %62 = vector.broadcast %61 : f32 to vector<1x512xf32>
    %63 = arith.mulf %60, %62 : vector<1x512xf32>
    %64 = arith.addf %59, %63 : vector<1x512xf32>
    %c2_5 = arith.constant 2 : index
    %65 = memref.load %arg3[%c2_5] : memref<3xf32, #tpu.memory_space<smem>>
    %66 = vector.broadcast %65 : f32 to vector<1x512xf32>
    %67 = arith.addf %64, %66 : vector<1x512xf32>
    %68 = arith.maximumf %23, %45 : vector<1x512xf32>
    %69 = arith.maximumf %68, %67 : vector<1x512xf32>
    %70 = arith.subf %23, %69 : vector<1x512xf32>
    %71 = math.exp %70 : vector<1x512xf32>
    %72 = arith.subf %45, %69 : vector<1x512xf32>
    %73 = math.exp %72 : vector<1x512xf32>
    %74 = arith.subf %67, %69 : vector<1x512xf32>
    %75 = math.exp %74 : vector<1x512xf32>
    %76 = arith.addf %71, %73 : vector<1x512xf32>
    %77 = arith.addf %76, %75 : vector<1x512xf32>
    %78 = tpu.reciprocal %77 {approx = true} : vector<1x512xf32> -> vector<1x512xf32>
    %79 = arith.mulf %71, %78 : vector<1x512xf32>
    %c0_6 = arith.constant 0 : index
    %c0_7 = arith.constant 0 : index
    %c0_8 = arith.constant 0 : index
    %80 = vector.load %arg5[%c0_6, %c0_7, %c0_8] : memref<1x3x512xf32, #tpu.memory_space<vmem>>, vector<1x1x512xf32>
    %81 = vector.shape_cast %80 : vector<1x1x512xf32> to vector<1x512xf32>
    %82 = vector.shape_cast %79 : vector<1x512xf32> to vector<1x1x512xf32>
    tpu.vector_store %arg5[%c0_6, %c0_7, %c0_8], %82 {strides = array<i32>} : memref<1x3x512xf32, #tpu.memory_space<vmem>>, vector<1x1x512xf32>,
    %83 = arith.mulf %73, %78 : vector<1x512xf32>
    %c0_9 = arith.constant 0 : index
    %c1_10 = arith.constant 1 : index
    %c0_11 = arith.constant 0 : index
    %84 = vector.load %arg5[%c0_9, %c1_10, %c0_11] : memref<1x3x512xf32, #tpu.memory_space<vmem>>, vector<1x1x512xf32>
    %85 = vector.shape_cast %84 : vector<1x1x512xf32> to vector<1x512xf32>
    %86 = vector.shape_cast %83 : vector<1x512xf32> to vector<1x1x512xf32>
    tpu.vector_store %arg5[%c0_9, %c1_10, %c0_11], %86 {strides = array<i32>} : memref<1x3x512xf32, #tpu.memory_space<vmem>>, vector<1x1x512xf32>,
    %87 = arith.mulf %75, %78 : vector<1x512xf32>
    %c0_12 = arith.constant 0 : index
    %c2_13 = arith.constant 2 : index
    %c0_14 = arith.constant 0 : index
    %88 = vector.load %arg5[%c0_12, %c2_13, %c0_14] : memref<1x3x512xf32, #tpu.memory_space<vmem>>, vector<1x1x512xf32>
    %89 = vector.shape_cast %88 : vector<1x1x512xf32> to vector<1x512xf32>
    %90 = vector.shape_cast %87 : vector<1x512xf32> to vector<1x1x512xf32>
    tpu.vector_store %arg5[%c0_12, %c2_13, %c0_14], %90 {strides = array<i32>} : memref<1x3x512xf32, #tpu.memory_space<vmem>>, vector<1x1x512xf32>,
    return
  }
  func.func @transform_0(%arg0: i32, %arg1: i32, %arg2: memref<12xf32, #tpu.memory_space<smem>>, %arg3: memref<3xf32, #tpu.memory_space<smem>>) -> (i32, i32, i32) {
    %c0_i32 = arith.constant 0 : i32
    %c0_i32_0 = arith.constant 0 : i32
    return %arg0, %c0_i32, %arg1 : i32, i32, i32
  }
  func.func @transform_1(%arg0: i32, %arg1: i32, %arg2: memref<12xf32, #tpu.memory_space<smem>>, %arg3: memref<3xf32, #tpu.memory_space<smem>>) -> (i32, i32, i32) {
    %c0_i32 = arith.constant 0 : i32
    %c0_i32_0 = arith.constant 0 : i32
    return %arg0, %c0_i32, %arg1 : i32, i32, i32
  }
}

</mosaic_0001>

<bundles_post_ra>
// kernel: seghead_block.1
= control target key start
LH: loop header
LB: loop body
LE: loop exit
PB: predicated region body
PF: predicated region fallthrough
CT: control target
= control target key end

     0   :  { %s621_s18 = smov [#allocation3]   ;;  %s622_s19 = smov [#allocation4]   ;;  %s757_s0 = inlined_call_operand.vmem [shape: f32[12], index: 0, kind: input, shape index: {}]   ;;  %s758_s2 = inlined_call_operand.vmem [shape: f32[2,4,512], index: 2, kind: input, shape index: {}]   ;;  %s759_s3 = inlined_call_operand.vmem [shape: f32[2,3,512], index: 3, kind: output, shape index: {}]   ;;  %s760_s1 = inlined_call_operand.vmem [shape: f32[3], index: 1, kind: input, shape index: {}]  }
   0x1   :  { %s9_s14 = sshll.u32 %s757_s0, 4  ;;  %s14_s17 = sshll.u32 %s760_s1, 4  ;;  %s10_s14 = int_to_ptr.vmem [resolvable:$true] %s9_s14  ;;  %s15_s17 = int_to_ptr.vmem [resolvable:$true] %s14_s17 }
   0x2   :  { %12 = dma.vmem_to_smem %s10_s14, 16, %s621_s18, [#allocation2] }
   0x3   :  { %17 = dma.vmem_to_smem %s15_s17, 16, %s622_s19, [#allocation2] }
   0x4   :  { %607 = dma.done.wait [#allocation2], 32 }
   0x5   :  { %608 = vsyncadd [#allocation2], 4294967264 }
   0x6   :  { %20 = sfence }
   0x7   :  { %s649_s20 = smov 0   ;;  %s651_s21 = smov 0  }
   0x8   :  { %s653_s22 = smov 0  }
   0x9 LB: > { %s38_s0 = sadd.s32 1, %s615_s21  ;;  %p487_p0 = scmp.ge.s32.totalorder %s619_s22, 1  ;;  %s619_s22 = sphi %s653_s22, %s26_s22   ;;  %s615_s21 = sphi %s651_s21, %s764_s21   ;;  %s611_s20 = sphi %s649_s20, %s763_s20  }
   0xa   : > { %p40_p1 = scmp.ge.s32.totalorder %s38_s0, 2  ;;  %p123_p2 = scmp.lt.s32.totalorder %s619_s22, 3 }
   0xc   : > { %s766_s0 = smov (%p40_p1, %s38_s0), 0  ;;  %p124_p3 = pnand %p487_p0, %p123_p2 }
   0xd   : > { %p152_p4 = scmp.lt.s32.totalorder (!%p124_p3), %s611_s20, 1  ;;  %s173_s1 = sld [smem:[#allocation3]] (!%p124_p3) }
   0xe   : > { %127 = sbr.rel (%p124_p3) target bundleno = 84 (0x54), region = 24  ;;  %s492_s23 = sld [smem:[#allocation3 + $0x1]] (!%p124_p3) }
   0xf   : > { %s495_s24 = sld [smem:[#allocation3 + $0x2]] (!%p124_p3) }
  0x10   : > { %s498_s26 = sld [smem:[#allocation3 + $0x3]] (!%p124_p3) }
  0x11   : > { %s679_s30 = sld [smem:[#allocation4]] (!%p124_p3) }
  0x12   : > { %s501_s4 = sld [smem:[#allocation3 + $0x4]] (!%p124_p3) }
  0x13   : > { %s768_s20 = smov (!%p152_p4, %s611_s20), 1  ;;  %v174_v2 = vstv %s173_s1  ;;  %s502_s5 = sld [smem:[#allocation3 + $0x5]]  ;;  %vm358_vm0 = vcmask 1040384   ;;  %vm360_vm1 = vcmask 1042434   ;;  %vm362_vm2 = vcmask 1041408  }
  0x14   : > { %s527_s25 = sshll.u32 %s768_s20, 4  ;;  %v178_v3 = vstv %s492_s23  ;;  %s505_s6 = sld [smem:[#allocation3 + $0x6]] }
  0x15   : > { %s159_s29 = scalar_lea.vmem %s758_s2, %s527_s25  ;;  %v192_v8 = vstv %s495_s24  ;;  %s687_s7 = sld [smem:[#allocation3 + $0x7]] }
  0x16   : > { %v675_v0 = vld [vmem:[%s159_s29] sm:$0xff]  ;;  %v677_v1 = vld [vmem:[%s159_s29 + $0x8] sm:$0xff]  ;;  %v206_v13 = vstv %s498_s26  ;;  %s689_s8 = sld [smem:[#allocation4 + $0x1]]  ;;  %s169_s16 = scalar_lea.vmem %s759_s3, %s527_s25 }
  0x17   : > { %v175_v4 = vmul.f32 %v174_v2, %v675_v0  ;;  %v176_v5 = vmul.f32 %v174_v2, %v677_v1  ;;  %v179_v6 = vmul.f32 %v178_v3, %v675_v0  ;;  %v180_v7 = vmul.f32 %v178_v3, %v677_v1  ;;  %s691_s9 = sld [smem:[#allocation3 + $0x8]] }
  0x18   : > { %v193_v11 = vmul.f32 %v192_v8, %v675_v0  ;;  %v194_v12 = vmul.f32 %v192_v8, %v677_v1  ;;  %v207_v18 = vmul.f32 %v206_v13, %v675_v0  ;;  %v208_v19 = vmul.f32 %v206_v13, %v677_v1  ;;  %s695_s10 = sld [smem:[#allocation3 + $0x9]] }
  0x19   : > { %v493_v9 = vrot.slane %v179_v6, 9  ;;  %v494_v10 = vrot.slane %v180_v7, 9  ;;  %v224_v20 = vstv %s501_s4  ;;  %s699_s11 = sld [smem:[#allocation3 + $0xa]]  ;;  %v228_v27 = vstv %s502_s5 }
  0x1a   : > { %v496_v16 = vrot.slane %v193_v11, 10  ;;  %v497_v17 = vrot.slane %v194_v12, 10  ;;  %v225_v23 = vmul.f32 %v224_v20, %v675_v0  ;;  %v226_v24 = vmul.f32 %v224_v20, %v677_v1  ;;  %s701_s12 = sld [smem:[#allocation3 + $0xb]] }
  0x1b   : > { %v189_v14 = vadd.f32 %v493_v9, %v175_v4  ;;  %v190_v15 = vadd.f32 %v494_v10, %v176_v5  ;;  %v499_v25 = vrot.slane %v207_v18, 11  ;;  %v500_v26 = vrot.slane %v208_v19, 11  ;;  %s522_s13 = sld [smem:[#allocation4 + $0x2]] }
  0x1c   : > { %v242_v28 = vstv %s505_s6  ;;  %v229_v29 = vmul.f32 %v228_v27, %v675_v0  ;;  %v230_v30 = vmul.f32 %v228_v27, %v677_v1  ;;  %v220_v34 = vstv %s679_s30 }
  0x1d   : > { %v203_v21 = vadd.f32 %v496_v16, %v189_v14  ;;  %v204_v22 = vadd.f32 %v497_v17, %v190_v15  ;;  %v243_v31 = vmul.f32 %v242_v28, %v675_v0  ;;  %v244_v32 = vmul.f32 %v242_v28, %v677_v1 }
  0x1e   : > { %v256_v35 = vstv %s687_s7  ;;  %v503_v36 = vrot.slane %v229_v29, 9  ;;  %v504_v37 = vrot.slane %v230_v30, 9  ;;  %v270_v43 = vstv %s689_s8 }
  0x1f   : > { %v217_v33 = vadd.f32 %v499_v25, %v203_v21  ;;  %v506_v38 = vrot.slane %v243_v31, 10  ;;  %v507_v39 = vrot.slane %v244_v32, 10  ;;  %v218_v40 = vadd.f32 %v500_v26, %v204_v22 }
  0x20   : > { %v257_v41 = vmul.f32 %v256_v35, %v675_v0  ;;  %v258_v42 = vmul.f32 %v256_v35, %v677_v1  ;;  %v239_v44 = vadd.f32 %v503_v36, %v225_v23  ;;  %v240_v45 = vadd.f32 %v504_v37, %v226_v24 }
  0x21   : > { %v274_v46 = vstv %s691_s9  ;;  %v278_v47 = vstv %s695_s10  ;;  %v221_v56 = vadd.f32 %v220_v34, %v217_v33  ;;  %v222_v57 = vadd.f32 %v220_v34, %v218_v40 }
  0x22   : > { %v509_v48 = vrot.slane %v257_v41, 11  ;;  %v510_v49 = vrot.slane %v258_v42, 11  ;;  %v275_v50 = vmul.f32 %v274_v46, %v675_v0  ;;  %v276_v51 = vmul.f32 %v274_v46, %v677_v1 }
  0x23   : > { %v253_v52 = vadd.f32 %v506_v38, %v239_v44  ;;  %v254_v53 = vadd.f32 %v507_v39, %v240_v45  ;;  %v279_v54 = vmul.f32 %v278_v47, %v675_v0  ;;  %v280_v55 = vmul.f32 %v278_v47, %v677_v1 }
  0x24   : > { %v292_v58 = vstv %s699_s11  ;;  %v306_v59 = vstv %s701_s12  ;;  %v320_v16 = vstv %s522_s13  ;;  %v365_v45 = vlaneseq }
  0x25   : > { %v267_v60 = vadd.f32 %v509_v48, %v253_v52  ;;  %v268_v61 = vadd.f32 %v510_v49, %v254_v53  ;;  %v514_v62 = vrot.slane %v279_v54, 9  ;;  %v515_v63 = vrot.slane %v280_v55, 9 }
  0x26   : > { %v293_v2 = vmul.f32 %v292_v58, %v675_v0  ;;  %v294_v3 = vmul.f32 %v292_v58, %v677_v1  ;;  %v307_v4 = vmul.f32 %v306_v59, %v675_v0  ;;  %v308_v5 = vmul.f32 %v306_v59, %v677_v1 }
  0x27   : > { %v271_v6 = vadd.f32 %v270_v43, %v267_v60  ;;  %v272_v7 = vadd.f32 %v270_v43, %v268_v61  ;;  %v289_v8 = vadd.f32 %v514_v62, %v275_v50  ;;  %v290_v9 = vadd.f32 %v515_v63, %v276_v51 }
  0x28   : > { %v517_v10 = vrot.slane %v293_v2, 10  ;;  %v518_v11 = vrot.slane %v294_v3, 10  ;;  %v520_v12 = vrot.slane %v307_v4, 11  ;;  %v521_v13 = vrot.slane %v308_v5, 11 }
  0x29   : > { %v323_v19 = vmax.f32 %v221_v56, %v271_v6  ;;  %v324_v20 = vmax.f32 %v222_v57, %v272_v7  ;;  %vm724_vm3 = vcmp.lt.s32.totalorder %v365_v45, 512 }
  0x2a   : > { %v303_v14 = vadd.f32 %v517_v10, %v289_v8  ;;  %v304_v15 = vadd.f32 %v518_v11, %v290_v9 }
  0x2c   : > { %v317_v17 = vadd.f32 %v520_v12, %v303_v14  ;;  %v318_v18 = vadd.f32 %v521_v13, %v304_v15 }
  0x2e   : > { %v321_v21 = vadd.f32 %v320_v16, %v317_v17  ;;  %v322_v22 = vadd.f32 %v320_v16, %v318_v18 }
  0x30   : > { %v325_v0 = vmax.f32 %v323_v19, %v321_v21  ;;  %v326_v23 = vmax.f32 %v324_v20, %v322_v22 }
  0x32   : > { %v327_v1 = vsub.f32 %v221_v56, %v325_v0  ;;  %v328_v24 = vsub.f32 %v222_v57, %v326_v23  ;;  %v333_v25 = vsub.f32 %v271_v6, %v325_v0  ;;  %v334_v26 = vsub.f32 %v272_v7, %v326_v23 }
  0x33   : > { %v339_v27 = vsub.f32 %v321_v21, %v325_v0  ;;  %v340_v28 = vsub.f32 %v322_v22, %v326_v23 }
  0x34   : > { %v329_v29 = vmul.f32 1.442695, %v327_v1  ;;  %v331_v30 = vmul.f32 1.442695, %v328_v24  ;;  %v335_v31 = vmul.f32 1.442695, %v333_v25 }
  0x35   : > { %v337_v32 = vmul.f32 1.442695, %v334_v26  ;;  %v341_v33 = vmul.f32 1.442695, %v339_v27  ;;  %v343_v34 = vmul.f32 1.442695, %v340_v28 }
  0x36   : > { %555 = vpow2.f32 %v329_v29 }
  0x37   : > { %557 = vpow2.f32 %v331_v30 }
  0x38   : > { %559 = vpow2.f32 %v335_v31 }
  0x39   : > { %561 = vpow2.f32 %v337_v32 }
  0x3a   : > { %563 = vpow2.f32 %v341_v33 }
  0x3b   : > { %565 = vpow2.f32 %v343_v34 }
  0x3c   : > { %v556_v35 = vpop.eup %555 }
  0x3d   : > { %v558_v36 = vpop.eup %557 }
  0x3e   : > { %v560_v37 = vpop.eup %559 }
  0x3f   : > { %v562_v38 = vpop.eup %561  ;;  %v345_v39 = vadd.f32 %v560_v37, %v556_v35 }
  0x40   : > { %v564_v40 = vpop.eup %563  ;;  %v346_v41 = vadd.f32 %v562_v38, %v558_v36 }
  0x41   : > { %v566_v42 = vpop.eup %565  ;;  %v347_v43 = vadd.f32 %v564_v40, %v345_v39 }
  0x42   : > { %v348_v44 = vadd.f32 %v566_v42, %v346_v41 }
  0x43   : > { %567 = vrcp.f32 %v347_v43 }
  0x44   : > { %569 = vrcp.f32 %v348_v44 }
  0x49   : > { %v568_v46 = vpop.eup %567 }
  0x4a   : > { %v570_v47 = vpop.eup %569  ;;  %v351_v48 = vmul.f32 %v568_v46, %v556_v35  ;;  %v370_v49 = vmul.f32 %v568_v46, %v560_v37  ;;  %v383_v50 = vmul.f32 %v568_v46, %v564_v40 }
  0x4b   : > { %v352_v51 = vmul.f32 %v570_v47, %v558_v36  ;;  %v371_v52 = vmul.f32 %v570_v47, %v562_v38  ;;  %v384_v53 = vmul.f32 %v570_v47, %v566_v42 }
  0x4c   : > { %v355_v54 = vrot.slane %v351_v48, 3  ;;  %v374_v56 = vrot.slane %v370_v49, 3  ;;  %v387_v57 = vrot.slane %v383_v50, 3 }
  0x4d   : > { %v356_v58 = vrot.slane %v352_v51, 6  ;;  %v357_v59 = vrot.slane %v352_v51, 1  ;;  %v375_v60 = vrot.slane %v371_v52, 6  ;;  %v376_v61 = vrot.slane %v371_v52, 1 }
  0x4e   : > { %v359_v62 = vsel %vm358_vm0, %v351_v48, %v355_v54  ;;  %v377_v63 = vsel %vm358_vm0, %v370_v49, %v374_v56  ;;  %v388_v2 = vrot.slane %v384_v53, 6  ;;  %v389_v3 = vrot.slane %v384_v53, 1 }
  0x4f   : > { %v361_v4 = vsel %vm360_vm1, %v356_v58, %v357_v59  ;;  %v378_v5 = vsel %vm360_vm1, %v375_v60, %v376_v61  ;;  %v390_v6 = vsel %vm358_vm0, %v383_v50, %v387_v57 }
  0x50   : > { %v363_v7 = vsel %vm362_vm2, %v359_v62, %v361_v4  ;;  %v379_v8 = vsel %vm362_vm2, %v377_v63, %v378_v5  ;;  %v391_v9 = vsel %vm360_vm1, %v388_v2, %v389_v3 }
  0x51   : > { %369 = vst.msk [vmem:[%s169_s16] ss:$4 sm:$0xf] %vm724_vm3, %v363_v7  ;;  %v392_v10 = vsel %vm362_vm2, %v390_v6, %v391_v9 }
  0x52   : > { %523 = vst.msk [vmem:[%s169_s16 + $0x1] ss:$4 sm:$0xf] %vm724_vm3, %v379_v8 }
  0x53   : > { %524 = vst.msk [vmem:[%s169_s16 + $0x2] ss:$4 sm:$0xf] %vm724_vm3, %v392_v10 }
  0x54 PF: > { %s26_s22 = sadd.s32 1, %s619_s22   ;;  %s763_s20 = smov %s615_s21 }
  0x55   : > { %p23_p5 = scmp.ge.s32.totalorder %s26_s22, 4   ;;  %s764_s21 = smov %s766_s0 }
  0x57   :  { %25 = sbr.rel (!%p23_p5) target bundleno = 9 (0x9), region = 56 }

</bundles_post_ra>
